<compile_context>
chip_gen: v7x
topology: tpu7x:2x2x1
jax: 0.10.0
libtpu: 0.0.40
codegen_flags: <defaults>
</compile_context>

<pallas_src>
import functools

import jax
import jax.numpy as jnp
from jax.experimental import pallas as pl
from jax.experimental.pallas import tpu as pltpu


# bf16 on the MXU (native on v5e/v6e/v7x); decode math stays f32.
_MXU_DTYPE = jnp.bfloat16
_MAX_ROW_TILE = 4096          # v5e-safe cap; footprint stays << scoped VMEM.


# ----------------------------------------------------------------------------
# Pallas kernel: fused 1x1 head conv  ->  (inference only) box/class decode.
# One grid step = one row tile of ONE of the three scales; per-step SMEM
# metadata (scalar prefetch) selects the scale's weights and geometry.
# ----------------------------------------------------------------------------
def _yolo_head_kernel(_sid_ref, loc_ref, gw_ref, gh_ref,
                      x_ref, w_ref, b_ref, *rest, decode, tm):
    if decode:
        c_ref, o_ref = rest
    else:
        (o_ref,) = rest

    raw = (jnp.dot(x_ref[...], w_ref[0], preferred_element_type=jnp.float32)
           + b_ref[0])

    if not decode:
        o_ref[...] = raw
        return

    g = pl.program_id(0)
    c = c_ref[0]                              # [6, Cout] packed constants
    pre, c_t, c_raw, c_x, c_y, c_c = (c[0:1], c[1:2], c[2:3],
                                      c[3:4], c[4:5], c[5:6])

    # Grid coordinates from the scale-local flat row index (rows are
    # (B, H, W)-flattened).  Division / modulo done in f32 — exact for the
    # magnitudes involved with a one-step fixup — so no dynamic integer
    # division needs to be lowered.
    row = (loc_ref[g]
           + jax.lax.broadcasted_iota(jnp.int32, (tm, 1), 0)).astype(jnp.float32)
    gw = gw_ref[g].astype(jnp.float32)
    gh = gh_ref[g].astype(jnp.float32)
    q1 = jnp.floor(row / gw)
    r1 = row - q1 * gw
    q1 = q1 + jnp.where(r1 < 0.0, -1.0, 0.0) + jnp.where(r1 >= gw, 1.0, 0.0)
    xs = row - q1 * gw                        # x index within the image row
    q2 = jnp.floor(q1 / gh)
    r2 = q1 - q2 * gh
    q2 = q2 + jnp.where(r2 < 0.0, -1.0, 0.0) + jnp.where(r2 >= gh, 1.0, 0.0)
    ys = q1 - q2 * gh                         # y index within the image

    t = jnp.tanh(raw * pre)                   # single transcendental pass
    o_ref[...] = c_t * t + c_raw * raw + c_x * xs + c_y * ys + c_c


# ----------------------------------------------------------------------------
# Wrapper: one pallas_call covering all three scales.
# ----------------------------------------------------------------------------
def _pick_row_tile(m_largest, cap=_MAX_ROW_TILE):
    # ~8 row-blocks on the largest scale: keeps >=2 grid steps so v7x's second
    # TensorCore gets work, and amortizes the ~0.35us per-step overhead while
    # limiting padding waste on the smaller scales.
    t = -(-m_largest // 8)        # ceil(M/8) rows per block
    t = -(-t // 8) * 8            # round up to a sublane multiple
    return int(max(8, min(cap, t)))


def fused_multiscale_head(rows, w_all, b_all, dec_consts, grids):
    """Run the YOLO head (and optional decode) for all scales in one launch.

    rows:       list of [M_i, Cin] arrays (common Cin, _MXU_DTYPE).
    w_all:      [3, Cin, Cout] stacked per-scale weights (_MXU_DTYPE).
    b_all:      [3, 1, Cout]   float32 biases.
    dec_consts: [3, 6, Cout]   float32 decode constants, or None (training).
    grids:      list of (H_i, W_i).
    Returns a list of [M_i, Cout] float32 arrays (raw logits or decoded boxes).
    """
    n_scale = len(rows)
    cin = int(rows[0].shape[1])
    assert all(int(r.shape[1]) == cin for r in rows)
    cout = int(w_all.shape[-1])
    ms = [int(r.shape[0]) for r in rows]
    tm = _pick_row_tile(max(ms))
    nbs = [-(-m // tm) for m in ms]
    mps = [nb * tm for nb in nbs]
    x_cat = jnp.concatenate(
        [jnp.pad(r, ((0, mp - m), (0, 0))) for r, m, mp in zip(rows, ms, mps)],
        axis=0)
    total = sum(mps)
    grid_steps = sum(nbs)

    # Per-grid-step metadata (scalar prefetch -> SMEM).
    sid, loc, gws, ghs = [], [], [], []
    for i in range(n_scale):
        h, w = grids[i]
        for j in range(nbs[i]):
            sid.append(i)
            loc.append(j * tm)
            gws.append(w)
            ghs.append(h)
    sid, loc, gws, ghs = (jnp.array(a, dtype=jnp.int32)
                          for a in (sid, loc, gws, ghs))

    decode = dec_consts is not None
    kernel = functools.partial(_yolo_head_kernel, decode=decode, tm=tm)

    # Row blocks are laid out consecutively, so the row-block index is simply
    # the grid step; only the weight/bias/const maps need the scale id.
    row_map = lambda g, sid, loc, gw, gh: (g, 0)
    scale_map = lambda g, sid, loc, gw, gh: (sid[g], 0, 0)

    in_specs = [
        pl.BlockSpec((tm, cin), row_map),
        pl.BlockSpec((1, cin, cout), scale_map),
        pl.BlockSpec((1, 1, cout), scale_map),
    ]
    args = [x_cat, w_all, b_all]
    if decode:
        in_specs.append(pl.BlockSpec((1, int(dec_consts.shape[1]), cout),
                                     scale_map))
        args.append(dec_consts)

    cost = pl.CostEstimate(
        flops=2 * total * cin * cout,
        transcendentals=total * cout if decode else 0,
        bytes_accessed=int(x_cat.size * x_cat.dtype.itemsize
                           + total * cout * 4
                           + w_all.size * w_all.dtype.itemsize
                           + b_all.size * b_all.dtype.itemsize
                           + (dec_consts.size * 4 if decode else 0)))

    y_cat = pl.pallas_call(
        kernel,
        out_shape=jax.ShapeDtypeStruct((total, cout), jnp.float32),
        grid_spec=pltpu.PrefetchScalarGridSpec(
            num_scalar_prefetch=4,
            grid=(grid_steps,),
            in_specs=in_specs,
            out_specs=pl.BlockSpec((tm, cout), row_map),
        ),
        compiler_params=pltpu.CompilerParams(
            dimension_semantics=("parallel",)),
        cost_estimate=cost,
    )(sid, loc, gws, ghs, *args)

    out, off = [], 0
    for m, mp in zip(ms, mps):
        out.append(y_cat[off:off + m])
        off += mp
    return out


def _pool_rows_nhwc(x_nhwc, stride):
    """Stand-in PAN feature: strided average pooling, NHWC, flattened rows."""
    b, hh, ww, c = x_nhwc.shape
    h, w = hh // stride, ww // stride
    pooled = x_nhwc.reshape(b, h, stride, w, stride, c).mean(axis=(2, 4))
    return pooled.reshape(b * h * w, c), (h, w)


# ----------------------------------------------------------------------------
# Modules (parameters held as plain jnp arrays, deterministic init)
# ----------------------------------------------------------------------------
class YOLOHeadPallas:
    def __init__(self, in_channel, num_class, label_assignment_method,
                 anchor_boxes, key):
        assert anchor_boxes is not None, "Anchor boxes must be given."
        self.label_assignment_method = label_assignment_method
        self.anchor_boxes = jnp.asarray(anchor_boxes, dtype=jnp.float32)
        assert self.anchor_boxes.shape[0] * self.anchor_boxes.shape[1] != 0
        assert self.anchor_boxes.shape[2] == 2
        self.num_anchor = int(self.anchor_boxes.shape[1])
        self.num_attrib = num_class + 5
        self.out_channel = self.num_anchor * self.num_attrib
        self.downsample_rate = (8, 16, 32)
        self.cin_list = [in_channel // 2 ** (2 - i) for i in range(3)]
        self.cin_pad = max(self.cin_list)     # common Cin for the fused launch

        self.weights, self.biases = [], []    # f32 (reference / weight folding)
        w_padded = []
        for cin in self.cin_list:
            key, kw, kb = jax.random.split(key, 3)
            w = jax.random.normal(kw, (cin, self.out_channel), jnp.float32) * 0.05
            b = jax.random.normal(kb, (self.out_channel,), jnp.float32) * 0.05
            self.weights.append(w)
            self.biases.append(b)
            w_padded.append(jnp.pad(w, ((0, self.cin_pad - cin), (0, 0))))
        # Cast ONCE to the MXU dtype (not per call).
        self.w_all = jnp.stack(w_padded).astype(_MXU_DTYPE)           # [3,Cin,Cout]
        self.b_all = jnp.stack([b.reshape(1, -1) for b in self.biases])  # f32

    def decode_consts(self, grids):
        """Per-scale affine decode constants [3, 6, Cout]; row order =
        (pre, coef_t, coef_raw, coef_x, coef_y, coef_const)."""
        A, NA = self.num_anchor, self.num_attrib
        cols = jnp.arange(A * NA)
        attrib = cols % NA
        a_idx = cols // NA
        is_sig = (attrib == 0) | (attrib >= 5)
        is_x = attrib == 1
        is_y = attrib == 2
        out = []
        for i, (h, w) in enumerate(grids):
            ds = float(self.downsample_rate[i])
            if self.label_assignment_method == "single_grid":
                pre_xy, t_x, t_y, c_xy = 0.5, 0.5 * ds, 0.5 * ds, 0.5 * ds
            elif self.label_assignment_method == "all_grid":
                pre_xy, t_x, t_y, c_xy = 1.0, w * ds, h * ds, 0.0
            elif self.label_assignment_method == "nearby_grid":
                pre_xy, t_x, t_y, c_xy = 1.0, 1.5 * ds, 1.5 * ds, 0.5 * ds
            else:
                raise NotImplementedError(self.label_assignment_method)
            aw = self.anchor_boxes[i, a_idx, 0]
            ah = self.anchor_boxes[i, a_idx, 1]
            pre = jnp.where(is_sig, 0.5, jnp.where(is_x | is_y, pre_xy, 0.0))
            c_t = jnp.where(is_sig, 0.5,
                            jnp.where(is_x, t_x, jnp.where(is_y, t_y, 0.0)))
            c_raw = jnp.where(attrib == 3, 4.0 * aw,
                              jnp.where(attrib == 4, 4.0 * ah, 0.0))
            c_x = jnp.where(is_x, ds, 0.0)
            c_y = jnp.where(is_y, ds, 0.0)
            c_c = jnp.where(is_sig, 0.5, jnp.where(is_x | is_y, c_xy, 0.0))
            out.append(jnp.stack([pre, c_t, c_raw, c_x, c_y, c_c]))
        return jnp.stack(out).astype(jnp.float32)                     # [3,6,Cout]

    def _finalize(self, y_rows, batch, h, w, is_training):
        A, NA = self.num_anchor, self.num_attrib
        f = jnp.transpose(y_rows.reshape(batch, h, w, A, NA), (0, 3, 1, 2, 4))
        return f if is_training else f.reshape(batch, -1, NA)

    def __call__(self, feats, is_training=True):
        rows, grids = [], []
        batch = feats[0].shape[0]
        for i in range(3):
            b, cin, h, w = feats[i].shape
            # TODO(synk): PAN/backbone deliver NCHW per the PyTorch API; a real
            #             NHWC end-to-end pipeline would drop this transpose.
            r = jnp.transpose(feats[i], (0, 2, 3, 1)).reshape(b * h * w, cin)
            if cin < self.cin_pad:
                r = jnp.pad(r, ((0, 0), (0, self.cin_pad - cin)))
            rows.append(r.astype(_MXU_DTYPE))
            grids.append((h, w))
        consts = None if is_training else self.decode_consts(grids)
        ys = fused_multiscale_head(rows, self.w_all, self.b_all, consts, grids)
        out = [self._finalize(y, batch, h, w, is_training)
               for y, (h, w) in zip(ys, grids)]
        return out if is_training else jnp.concatenate(out, axis=1)


class YOLOPallas:
    def __init__(self, num_class=1, label_assignment_method="nearby_grid",
                 anchor_boxes=None, last_channel=64, in_channel=3,
                 key=jax.random.PRNGKey(0)):
        assert label_assignment_method in ["single_grid", "all_grid", "nearby_grid"]
        self.last_channel = last_channel
        k1, k2, k3, k4 = jax.random.split(key, 4)
        # TODO(synk): backbone/SPP/PAN sources unavailable; deterministic
        #             stand-in (strided average pool + 1x1 projection).
        self.proj_w, self.proj_b = [], []
        for i, k in enumerate((k1, k2, k3)):
            cout = last_channel // 2 ** (2 - i)
            kw, kb = jax.random.split(k)
            self.proj_w.append(
                jax.random.normal(kw, (in_channel, cout), jnp.float32) * 0.1)
            self.proj_b.append(jax.random.normal(kb, (cout,), jnp.float32) * 0.1)
        self.det_head = YOLOHeadPallas(last_channel, num_class,
                                       label_assignment_method, anchor_boxes, k4)
        # Fold the stand-in projection into the head conv (exact affine
        # composition) once in f32, cast once to the MXU dtype.
        wf, bf = [], []
        for i in range(3):
            wf.append(self.proj_w[i] @ self.det_head.weights[i])
            bf.append(self.proj_b[i] @ self.det_head.weights[i]
                      + self.det_head.biases[i])
        self.w_fused = jnp.stack(wf).astype(_MXU_DTYPE)                # [3,C,Cout]
        self.b_fused = jnp.stack([b.reshape(1, -1) for b in bf])       # f32

    def __call__(self, x, is_training=True):
        head = self.det_head
        batch = x.shape[0]
        x_nhwc = jnp.transpose(x, (0, 2, 3, 1))     # single NCHW->NHWC pass
        rows, grids = [], []
        for s in head.downsample_rate:
            r, (h, w) = _pool_rows_nhwc(x_nhwc, s)
            rows.append(r.astype(_MXU_DTYPE))
            grids.append((h, w))
        consts = None if is_training else head.decode_consts(grids)
        ys = fused_multiscale_head(rows, self.w_fused, self.b_fused, consts, grids)
        out = [head._finalize(y, batch, h, w, is_training)
               for y, (h, w) in zip(ys, grids)]
        return out if is_training else jnp.concatenate(out, axis=1)


# ----------------------------------------------------------------------------
# Pure-JAX references (mirror the PyTorch forward semantics)
# ----------------------------------------------------------------------------
def decode_reference(raw_rows, batch, h, w, anchors, ds, method):
    A = anchors.shape[0]
    NA = raw_rows.shape[1] // A
    f = jnp.transpose(raw_rows.reshape(batch, h, w, A, NA), (0, 3, 1, 2, 4))
    xs = jnp.arange(w, dtype=jnp.float32).reshape(1, 1, 1, w)
    ys = jnp.arange(h, dtype=jnp.float32).reshape(1, 1, h, 1)
    a0 = jax.nn.sigmoid(f[..., 0])
    if method == "single_grid":
        a1 = (jax.nn.sigmoid(f[..., 1]) + xs) * ds
        a2 = (jax.nn.sigmoid(f[..., 2]) + ys) * ds
    elif method == "all_grid":
        a1 = (jnp.tanh(f[..., 1]) * w + xs) * ds
        a2 = (jnp.tanh(f[..., 2]) * h + ys) * ds
    else:  # nearby_grid
        a1 = (jnp.tanh(f[..., 1]) * 1.5 + 0.5 + xs) * ds
        a2 = (jnp.tanh(f[..., 2]) * 1.5 + 0.5 + ys) * ds
    anc = anchors.reshape(1, A, 1, 1, 2)
    a34 = f[..., 3:5] * 4.0 * anc
    a5 = jax.nn.sigmoid(f[..., 5:])
    dec = jnp.concatenate([a0[..., None], a1[..., None], a2[..., None], a34, a5],
                          axis=-1)
    return dec.reshape(batch, -1, NA)


def head_reference(head, feats, is_training=True, matmul_dtype=jnp.float32):
    """Pure-JAX YOLOHead mirror; matmul_dtype=f32 -> exact PyTorch semantics,
    matmul_dtype=_MXU_DTYPE -> matched precision with the bf16 kernel path."""
    out = []
    for i in range(3):
        b, cin, h, w = feats[i].shape
        rows = jnp.transpose(feats[i], (0, 2, 3, 1)).reshape(b * h * w, cin)
        raw = jnp.dot(rows.astype(matmul_dtype),
                      head.weights[i].astype(matmul_dtype),
                      preferred_element_type=jnp.float32) + head.biases[i]
        if is_training:
            out.append(jnp.transpose(
                raw.reshape(b, h, w, head.num_anchor, head.num_attrib),
                (0, 3, 1, 2, 4)))
        else:
            out.append(decode_reference(raw, b, h, w, head.anchor_boxes[i],
                                        float(head.downsample_rate[i]),
                                        head.label_assignment_method))
    return out if is_training else jnp.concatenate(out, axis=1)


def yolo_reference(model, x, is_training=True, use_fused=False):
    """use_fused=False: independent f32 un-fused proj->head reference.
    use_fused=True: matched-precision folded weights (the w/h decode columns
    amplify matmul rounding by 4*anchor, so the decode check matches the
    kernel's matmul precision)."""
    head = model.det_head
    batch = x.shape[0]
    x_nhwc = jnp.transpose(x, (0, 2, 3, 1))
    out = []
    for i, s in enumerate(head.downsample_rate):
        rows, (h, w) = _pool_rows_nhwc(x_nhwc, s)
        if use_fused:
            raw = jnp.dot(rows.astype(_MXU_DTYPE), model.w_fused[i],
                          preferred_element_type=jnp.float32) + model.b_fused[i]
        else:
            f = rows @ model.proj_w[i] + model.proj_b[i]
            raw = f @ head.weights[i] + head.biases[i]
        if is_training:
            out.append(jnp.transpose(
                raw.reshape(batch, h, w, head.num_anchor, head.num_attrib),
                (0, 3, 1, 2, 4)))
        else:
            out.append(decode_reference(raw, batch, h, w, head.anchor_boxes[i],
                                        float(s), head.label_assignment_method))
    return out if is_training else jnp.concatenate(out, axis=1)


def standin_features_ref(model, x):
    head = model.det_head
    batch = x.shape[0]
    x_nhwc = jnp.transpose(x, (0, 2, 3, 1))
    feats = []
    for i, s in enumerate(head.downsample_rate):
        rows, (h, w) = _pool_rows_nhwc(x_nhwc, s)
        f = rows @ model.proj_w[i] + model.proj_b[i]
        feats.append(jnp.transpose(f.reshape(batch, h, w, -1), (0, 3, 1, 2)))
    return feats


# ----------------------------------------------------------------------------
if __name__ == "__main__":
    anchor_boxes = [
        [[10.0, 13.0], [16.0, 30.0], [33.0, 23.0]],
        [[30.0, 61.0], [62.0, 45.0], [59.0, 119.0]],
        [[116.0, 90.0], [156.0, 198.0], [373.0, 326.0]],
    ]
    model = YOLOPallas(
        num_class=1,
        label_assignment_method="nearby_grid",
        anchor_boxes=anchor_boxes,
        last_channel=64,
        key=jax.random.PRNGKey(1),
    )
    x = jax.random.normal(jax.random.PRNGKey(0), (2, 3, 64, 64), jnp.float32)

    # ---- full model: training (list of [B,A,H,W,NA]) and inference -----------
    train_out = [jax.block_until_ready(t) for t in model(x, is_training=True)]
    infer_out = jax.block_until_ready(model(x, is_training=False))

    # Training logits vs an independent f32, un-fused reference (validates the
    # weight folding, the bf16 matmul and all multi-scale plumbing).
    ref_train = yolo_reference(model, x, is_training=True, use_fused=False)
    for a, b in zip(train_out, ref_train):
        assert a.shape == b.shape
        assert jnp.allclose(a, b, rtol=2e-2, atol=2e-2)
    # Decoded boxes vs a matched-precision reference (independent decode impl).
    ref_infer = yolo_reference(model, x, is_training=False, use_fused=True)
    assert infer_out.shape == ref_infer.shape
    assert jnp.allclose(infer_out, ref_infer, rtol=2e-2, atol=2e-2)

    # ---- head-only API (mirrors PyTorch YOLOHead) on precomputed features ----
    feats = standin_features_ref(model, x)
    head = model.det_head
    head_train = [jax.block_until_ready(t) for t in head(feats, is_training=True)]
    head_infer = jax.block_until_ready(head(feats, is_training=False))
    ref_ht = head_reference(head, feats, is_training=True)                 # f32
    ref_hi = head_reference(head, feats, is_training=False,
                            matmul_dtype=_MXU_DTYPE)
    for a, b in zip(head_train, ref_ht):
        assert a.shape == b.shape
        assert jnp.allclose(a, b, rtol=2e-2, atol=2e-2)
    assert head_infer.shape == ref_hi.shape
    assert jnp.allclose(head_infer, ref_hi, rtol=2e-2, atol=2e-2)

    print("KERNEL_OK")
</pallas_src>

<mosaic_0001>
module attributes {stable_mosaic.version = 11 : i64} {
  func.func @_yolo_head_kernel(%arg0: i32, %arg1: memref<11xi32, #tpu.memory_space<smem>>, %arg2: memref<11xi32, #tpu.memory_space<smem>>, %arg3: memref<11xi32, #tpu.memory_space<smem>>, %arg4: memref<11xi32, #tpu.memory_space<smem>>, %arg5: memref<16x3xbf16, #tpu.memory_space<vmem>>, %arg6: memref<1x3x18xbf16, #tpu.memory_space<vmem>>, %arg7: memref<1x1x18xf32, #tpu.memory_space<vmem>>, %arg8: memref<16x18xf32, #tpu.memory_space<vmem>>) attributes {dimension_semantics = [#tpu.dimension_semantics<parallel>], iteration_bounds = array<i64: 11>, scalar_prefetch = 4 : i64, scratch_operands = 0 : i64, tpu.core_type = #tpu.core_type<tc>, window_params = [{transform_indices = @transform_0, window_bounds = array<i64: 16, 3>}, {transform_indices = @transform_1, window_bounds = array<i64: 1, 3, 18>}, {transform_indices = @transform_2, window_bounds = array<i64: 1, 1, 18>}, {transform_indices = @transform_3, window_bounds = array<i64: 16, 18>}]} {
    %c0 = arith.constant 0 : index
    %c0_0 = arith.constant 0 : index
    %0 = vector.load %arg5[%c0, %c0_0] : memref<16x3xbf16, #tpu.memory_space<vmem>>, vector<16x3xbf16>
    %c0_1 = arith.constant 0 : index
    %c0_2 = arith.constant 0 : index
    %c0_3 = arith.constant 0 : index
    %1 = vector.load %arg6[%c0_1, %c0_2, %c0_3] : memref<1x3x18xbf16, #tpu.memory_space<vmem>>, vector<1x3x18xbf16>
    %2 = vector.shape_cast %1 : vector<1x3x18xbf16> to vector<3x18xbf16>
    %cst = arith.constant dense<0.000000e+00> : vector<16x18xf32>
    %3 = tpu.matmul %0, %2, %cst {dimension_numbers = #tpu.dot_dimension_numbers<[1], [0], [0], [1], [0, 0, 1, 1], [], []>} : vector<16x3xbf16>, vector<3x18xbf16>, vector<16x18xf32> -> vector<16x18xf32>
    %c0_4 = arith.constant 0 : index
    %c0_5 = arith.constant 0 : index
    %c0_6 = arith.constant 0 : index
    %4 = vector.load %arg7[%c0_4, %c0_5, %c0_6] : memref<1x1x18xf32, #tpu.memory_space<vmem>>, vector<1x1x18xf32>
    %5 = vector.shape_cast %4 : vector<1x1x18xf32> to vector<1x18xf32>
    %6 = vector.broadcast %5 : vector<1x18xf32> to vector<16x18xf32>
    %7 = arith.addf %3, %6 : vector<16x18xf32>
    %c0_7 = arith.constant 0 : index
    %c0_8 = arith.constant 0 : index
    %8 = vector.load %arg8[%c0_7, %c0_8] : memref<16x18xf32, #tpu.memory_space<vmem>>, vector<16x18xf32>
    tpu.vector_store %arg8[%c0_7, %c0_8], %7 {strides = array<i32>} : memref<16x18xf32, #tpu.memory_space<vmem>>, vector<16x18xf32>,
    return
  }
  func.func @transform_0(%arg0: i32, %arg1: memref<11xi32, #tpu.memory_space<smem>>, %arg2: memref<11xi32, #tpu.memory_space<smem>>, %arg3: memref<11xi32, #tpu.memory_space<smem>>, %arg4: memref<11xi32, #tpu.memory_space<smem>>) -> (i32, i32) {
    %c0_i32 = arith.constant 0 : i32
    %c0_i32_0 = arith.constant 0 : i32
    return %arg0, %c0_i32 : i32, i32
  }
  func.func @transform_1(%arg0: i32, %arg1: memref<11xi32, #tpu.memory_space<smem>>, %arg2: memref<11xi32, #tpu.memory_space<smem>>, %arg3: memref<11xi32, #tpu.memory_space<smem>>, %arg4: memref<11xi32, #tpu.memory_space<smem>>) -> (i32, i32, i32) {
    %0 = arith.index_cast %arg0 : i32 to index
    %1 = memref.load %arg1[%0] : memref<11xi32, #tpu.memory_space<smem>>
    %c0_i32 = arith.constant 0 : i32
    %c0_i32_0 = arith.constant 0 : i32
    %c0_i32_1 = arith.constant 0 : i32
    return %1, %c0_i32, %c0_i32_0 : i32, i32, i32
  }
  func.func @transform_2(%arg0: i32, %arg1: memref<11xi32, #tpu.memory_space<smem>>, %arg2: memref<11xi32, #tpu.memory_space<smem>>, %arg3: memref<11xi32, #tpu.memory_space<smem>>, %arg4: memref<11xi32, #tpu.memory_space<smem>>) -> (i32, i32, i32) {
    %0 = arith.index_cast %arg0 : i32 to index
    %1 = memref.load %arg1[%0] : memref<11xi32, #tpu.memory_space<smem>>
    %c0_i32 = arith.constant 0 : i32
    %c0_i32_0 = arith.constant 0 : i32
    %c0_i32_1 = arith.constant 0 : i32
    return %1, %c0_i32, %c0_i32_0 : i32, i32, i32
  }
  func.func @transform_3(%arg0: i32, %arg1: memref<11xi32, #tpu.memory_space<smem>>, %arg2: memref<11xi32, #tpu.memory_space<smem>>, %arg3: memref<11xi32, #tpu.memory_space<smem>>, %arg4: memref<11xi32, #tpu.memory_space<smem>>) -> (i32, i32) {
    %c0_i32 = arith.constant 0 : i32
    %c0_i32_0 = arith.constant 0 : i32
    return %arg0, %c0_i32 : i32, i32
  }
}

</mosaic_0001>

<bundles_post_ra>
// kernel: tpu_custom_call.1
= control target key start
LH: loop header
LB: loop body
LE: loop exit
PB: predicated region body
PF: predicated region fallthrough
CT: control target
= control target key end

     0   :  { %s568_s0 = inlined_call_operand.vmem [shape: s32[11], index: 0, kind: input, shape index: {}]   ;;  %s569_s4 = inlined_call_operand.vmem [shape: bf16[176,3], index: 4, kind: input, shape index: {}]   ;;  %s570_s5 = inlined_call_operand.vmem [shape: bf16[3,3,18], index: 5, kind: input, shape index: {}]   ;;  %s571_s6 = inlined_call_operand.vmem [shape: f32[3,1,18], index: 6, kind: input, shape index: {}]   ;;  %s572_s7 = inlined_call_operand.vmem [shape: f32[176,18], index: 7, kind: output, shape index: {}]   ;;  %s573_s1 = inlined_call_operand.vmem [shape: s32[11], index: 1, kind: input, shape index: {}]   ;;  %s574_s2 = inlined_call_operand.vmem [shape: s32[11], index: 2, kind: input, shape index: {}]   ;;  %s575_s3 = inlined_call_operand.vmem [shape: s32[11], index: 3, kind: input, shape index: {}]  }
   0x1   :  { %s12_s26 = sshll.u32 %s568_s0, 4  ;;  %s16_s29 = sshll.u32 %s573_s1, 4  ;;  %s13_s26 = int_to_ptr.vmem [resolvable:$true] %s12_s26  ;;  %s17_s29 = int_to_ptr.vmem [resolvable:$true] %s16_s29 }
   0x2   :  { %s428_s30 = scalar_lea.vmem %s13_s26, 16  ;;  %p433_p1 = scmp.lt.s32.totalorder %s13_s26, %s13_s26 }
   0x3   :  { %p429_p0 = scmp.ne.s32.totalorder %s13_s26, %s428_s30  ;;  %p434_p2 = scmp.lt.s32.totalorder %s428_s30, %s428_s30 }
   0x5   :  { %p435_p3 = por %p434_p2, %p433_p1 }
   0x7   :  { %p436_p4 = pnand %p435_p3, %p429_p0 }
   0x9   :  { %439 = shalt.err (!%p436_p4)  }
   0xa   :  { %s486_s8 = smov [#allocation3]   ;;  %s440_s9 = scalar_lea.vmem %s17_s29, 16 }
   0xb   :  { %15 = dma.vmem_to_smem %s13_s26, 16, %s486_s8, [#allocation2] }
   0xc   :  { %p441_p5 = scmp.ne.s32.totalorder %s17_s29, %s440_s9  ;;  %p445_p6 = scmp.lt.s32.totalorder %s17_s29, %s17_s29 }
   0xd   :  { %p446_p7 = scmp.lt.s32.totalorder %s440_s9, %s440_s9 }
   0xf   :  { %p447_p8 = por %p446_p7, %p445_p6 }
  0x11   :  { %p448_p9 = pnand %p447_p8, %p441_p5 }
  0x13   :  { %451 = shalt.err (!%p448_p9)  }
  0x14   :  { %s487_s0 = smov [#allocation4]   ;;  %s20_s11 = sshll.u32 %s574_s2, 4  ;;  %s21_s11 = int_to_ptr.vmem [resolvable:$true] %s20_s11 }
  0x15   :  { %19 = dma.vmem_to_smem %s17_s29, 16, %s487_s0, [#allocation2] }
  0x16   :  { %s24_s14 = sshll.u32 %s575_s3, 4  ;;  %s452_s15 = scalar_lea.vmem %s21_s11, 16  ;;  %s25_s14 = int_to_ptr.vmem [resolvable:$true] %s24_s14 }
  0x17   :  { %p453_p10 = scmp.ne.s32.totalorder %s21_s11, %s452_s15  ;;  %p457_p11 = scmp.lt.s32.totalorder %s21_s11, %s21_s11 }
  0x18   :  { %p458_p12 = scmp.lt.s32.totalorder %s452_s15, %s452_s15 }
  0x1a   :  { %p459_p13 = por %p458_p12, %p457_p11 }
  0x1c   :  { %p460_p0 = pnand %p459_p13, %p453_p10 }
  0x1e   :  { %463 = shalt.err (!%p460_p0)  }
  0x1f   :  { %s488_s16 = smov [#allocation5]   ;;  %s464_s17 = scalar_lea.vmem %s25_s14, 16 }
  0x20   :  { %23 = dma.vmem_to_smem %s21_s11, 16, %s488_s16, [#allocation2] }
  0x21   :  { %p465_p1 = scmp.ne.s32.totalorder %s25_s14, %s464_s17  ;;  %p469_p2 = scmp.lt.s32.totalorder %s25_s14, %s25_s14 }
  0x22   :  { %p470_p3 = scmp.lt.s32.totalorder %s464_s17, %s464_s17 }
  0x24   :  { %p471_p4 = por %p470_p3, %p469_p2 }
  0x26   :  { %p472_p5 = pnand %p471_p4, %p465_p1 }
  0x28   :  { %475 = shalt.err (!%p472_p5)  }
  0x29   :  { %s489_s2 = smov [#allocation6]  }
  0x2a   :  { %27 = dma.vmem_to_smem %s25_s14, 16, %s489_s2, [#allocation2] }
  0x2b   :  { %480 = dma.done.wait [#allocation2], 64 }
  0x2c   :  { %481 = vsyncadd [#allocation2], 4294967232 }
  0x2d   :  { %29 = sfence }
  0x2e   :  { %s545_s3 = smov 0  }
  0x2f LB: > { %s389_s18 = sadd.s32 4294967295, %s484_s3   ;;  %p393_p6 = scmp.ge.s32.totalorder %s484_s3, 1  ;;  %s484_s3 = sphi %s545_s3, %s35_s3  }
  0x30   : > { %p185_p7 = scmp.lt.s32.totalorder %s484_s3, 12 }
  0x32   : > { %p186_p8 = pnand %p393_p6, %p185_p7 }
  0x33   : > { %s224_s19 = sld [smem:[#allocation3 + %s389_s18]] (!%p186_p8)  ;;  %s394_s20 = sshll.u32 (!%p186_p8), %s389_s18, 1  ;;  %v490_v0 = vmov (!%p186_p8), 0.0   ;;  %vm491_vm0 = vmmov (!%p186_p8), 0   ;;  %vm261_vm1 = vcmask (!%p186_p8), 1040384   ;;  %vm262_vm2 = vcmask (!%p186_p8), 1041408  }
  0x34   : > { %189 = sbr.rel (%p186_p8) target bundleno = 285 (0x11d), region = 32  ;;  %406 = vmatprep.subr.bf16.mxu0 (!%p186_p8), %v490_v0  ;;  %p219_p9 = scmp.lt.s32.totalorder (!%p186_p8), %s394_s20, 21  ;;  %408 = vmatprep.mubr.msk.bf16.mxu0 (!%p186_p8), %vm491_vm0, %v490_v0  ;;  %v492_v1 = vmov (!%p186_p8), 65535   ;;  %vm257_vm3 = vcmask (!%p186_p8), 23552   ;;  %vm309_vm4 = vcmask (!%p186_p8), 146432  }
  0x35   : > { %v263_v2 = vsel (!%p186_p8), %vm261_vm1, 4294967295, %v492_v1  ;;  %s230_s29 = sld [smem:[#allocation3 + %s389_s18]] (!%p186_p8) }
  0x36   : > { %v264_v3 = vsel (!%p186_p8), %vm262_vm2, %v263_v2, 0 }
  0x39   : > { %p225_p10 = scmp.lt.s32.totalorder (!%p186_p8), %s224_s19, 2 }
  0x3b   : > { %s577_s20 = smov (!%p219_p9, %s394_s20), 21  ;;  %s579_s19 = smov (!%p225_p10, %s224_s19), 2 }
  0x3c   : > { %s395_s21 = sshll.u32 %s577_s20, 2  ;;  %s396_s25 = sshll.u32 %s579_s19, 1 }
  0x3d   : > { %s222_s24 = scalar_lea.vmem %s569_s4, %s395_s21  ;;  %s228_s28 = scalar_lea.vmem %s570_s5, %s396_s25 }
  0x3e   : > { %v244_v4 = vld [vmem:[%s228_s28] sm:$0x3]  ;;  %p231_p11 = scmp.lt.s32.totalorder %s230_s29, 2  ;;  %s398_s0 = sshll.u32 %s577_s20, 3 }
  0x3f   : > { %v266_v5 = vand.u32 %v264_v3, %v244_v4  ;;  %v427_v6 = vld [vmem:[%s222_s24] sm:$0xff]   ;;  %s239_s11 = scalar_lea.vmem %s572_s7, %s398_s0 }
  0x40   : > { %s581_s29 = smov (!%p231_p11, %s230_s29), 2 }
  0x41   : > { %407 = vmatpush3.bf16.msra.mxu0 %v266_v5  ;;  %s233_s9 = scalar_lea.vmem %s571_s6, %s581_s29 }
  0x42   : > { %v399_v7 = vld [vmem:[%s233_s9] ss:$0 sm:$0xff] }
  0x44   : > { %409 = vmatmul.mubr.msk.bf16.vlgmr.msra.gmra.mrb[0].mxu0 %vm257_vm3, %v427_v6 }
 0x117   : > { %v302_v8 = vpop.f32.mrb[0].mxu0 }
 0x118   : > { %v303_v9 = vadd.f32 %v399_v7, %v302_v8  ;;  %v410_v10 = vpop.f32.mrb[1].mxu0 }
 0x119   : > { %v305_v11 = vpop.f32.mrb[2].mxu0 }
 0x11a   : > { %310 = vst.msk [vmem:[%s239_s11] sm:$0xff] %vm309_vm4, %v303_v9  ;;  %v306_v12 = vadd.f32 %v399_v7, %v305_v11  ;;  %v411_v13 = vpop.f32.mrb[3].mxu0 }
 0x11c   : > { %311 = vst.msk [vmem:[%s239_s11 + $0x8] sm:$0xff] %vm309_vm4, %v306_v12 }
 0x11d PF: > { %s35_s3 = sadd.s32 1, %s484_s3  }
 0x11e   : > { %p32_p12 = scmp.ge.s32.totalorder %s35_s3, 13  }
 0x120   :  { %34 = sbr.rel (!%p32_p12) target bundleno = 47 (0x2f), region = 68 }

</bundles_post_ra>
